<compile_context>
chip_gen: v7x
topology: tpu7x:2x2x1
jax: 0.10.0
libtpu: 0.0.40
codegen_flags: <defaults>
</compile_context>

<pallas_src>
import functools

import jax
import jax.numpy as jnp
from jax.experimental import pallas as pl
from jax.experimental.pallas import tpu as pltpu

BN_EPS = 1e-5


def _round_up(x, m):
    return ((x + m - 1) // m) * m


def _vmem_capacity_bytes():
    try:
        cap = getattr(pltpu.get_tpu_info(), "vmem_capacity_bytes", None)
        if cap:
            return int(cap)
    except Exception:
        pass
    return 64 * 1024 * 1024  # conservative default (v7x per-TC VMEM)


def _choose_time_tile(T, row_bytes, target_bytes, granularity, min_steps=8):
    """Largest time tile (rows) such that the *padded* x tile stays near
    target_bytes, the tile is a multiple of `granularity` (sublane alignment
    for the lane-packed 2-D layout), and -- when T is large enough -- the grid
    keeps >= min_steps steps (DMA/compute overlap, v7x 2-TC sharding)."""
    if T <= granularity:
        return T
    tt = max(granularity, target_bytes // max(row_bytes, 1))
    tt = max(granularity, (tt // granularity) * granularity)
    if T >= 8 * min_steps:
        tt = min(tt, _round_up(max(T // min_steps, granularity), granularity))
    tt = min(tt, _round_up(T, granularity))
    return max(tt, granularity)


# --------------------------------------------------------------------------
# Lane-packed path: x viewed as (T, B*H); used when H is not a multiple of
# 128 and the segment matrices are small.
# --------------------------------------------------------------------------
def _bn_packed_kernel(x_ref, w_ref, b_ref, seg_ref, seg_t_ref, o_ref, *, batch):
    # x_ref: (tt, B*H) lane-dense; w/b: (1, H) f32; seg: (B*H, H); seg_t: (H, B*H)
    hi = jax.lax.Precision.HIGHEST
    x = x_ref[...].astype(jnp.float32)
    seg = seg_ref[...]
    seg_t = seg_t_ref[...]
    inv_b = jnp.float32(1.0 / batch)

    # Per-(t, h) batch statistics via segment-sum matmuls (MXU, lane-dense).
    mean = jnp.dot(x, seg, preferred_element_type=jnp.float32, precision=hi) * inv_b
    ex2 = jnp.dot(x * x, seg, preferred_element_type=jnp.float32, precision=hi) * inv_b
    var = jnp.maximum(ex2 - mean * mean, 0.0)  # clamp: one-pass cancellation guard

    w = w_ref[...]                                   # (1, H)
    b = b_ref[...]                                   # (1, H)
    scale = jax.lax.rsqrt(var + BN_EPS) * w          # (tt, H)
    shift = b - mean * scale                         # (tt, H)

    # Broadcast per-(t, h) factors back to the (t, b*H + h) lane layout.
    scale_f = jnp.dot(scale, seg_t, preferred_element_type=jnp.float32, precision=hi)
    shift_f = jnp.dot(shift, seg_t, preferred_element_type=jnp.float32, precision=hi)

    o_ref[...] = (x * scale_f + shift_f).astype(o_ref.dtype)


def _bn_packed_call(x, weight, bias, tile_target, vmem_limit):
    T, B, H = x.shape
    BH = B * H
    itemsize = jnp.dtype(x.dtype).itemsize

    # Padded VMEM bytes per time row (lanes rounded up to 128).
    row_bytes = _round_up(BH, 128) * itemsize
    tt = _choose_time_tile(T, row_bytes, tile_target, granularity=8)
    Tp = _round_up(T, tt)

    x2 = x.reshape(T, BH)
    if Tp != T:
        x2 = jnp.pad(x2, ((0, Tp - T), (0, 0)))

    w2 = weight.reshape(1, H).astype(jnp.float32)
    b2 = bias.reshape(1, H).astype(jnp.float32)

    lane = jnp.arange(BH, dtype=jnp.int32) % H
    seg = (lane[:, None] == jnp.arange(H, dtype=jnp.int32)[None, :]).astype(jnp.float32)
    seg_t = seg.T

    grid = (Tp // tt,)
    kernel = functools.partial(_bn_packed_kernel, batch=B)

    cost = pl.CostEstimate(
        flops=8 * Tp * BH + 4 * Tp * BH * H,
        transcendentals=Tp * H,
        bytes_accessed=2 * Tp * BH * itemsize + 2 * BH * H * 4,
    )

    out2 = pl.pallas_call(
        kernel,
        out_shape=jax.ShapeDtypeStruct((Tp, BH), x.dtype),
        grid_spec=pltpu.PrefetchScalarGridSpec(
            num_scalar_prefetch=0,
            grid=grid,
            in_specs=[
                pl.BlockSpec((tt, BH), lambda i: (i, 0)),
                # Constant index maps: fetched once, not re-DMA'd per step.
                pl.BlockSpec((1, H), lambda i: (0, 0)),
                pl.BlockSpec((1, H), lambda i: (0, 0)),
                pl.BlockSpec((BH, H), lambda i: (0, 0)),
                pl.BlockSpec((H, BH), lambda i: (0, 0)),
            ],
            out_specs=pl.BlockSpec((tt, BH), lambda i: (i, 0)),
        ),
        compiler_params=pltpu.CompilerParams(
            dimension_semantics=("parallel",),
            vmem_limit_bytes=vmem_limit,
        ),
        cost_estimate=cost,
    )(x2, w2, b2, seg, seg_t)

    return out2[:T].reshape(T, B, H)


# --------------------------------------------------------------------------
# 3-D fallback path (H a multiple of 128, or segment matrices too large).
# --------------------------------------------------------------------------
def _bn_3d_kernel(x_ref, w_ref, b_ref, o_ref, *, batch):
    x = x_ref[...].astype(jnp.float32)               # (tt, B, H)
    inv_b = jnp.float32(1.0 / batch)
    mean = jnp.sum(x, axis=1, keepdims=True) * inv_b
    ex2 = jnp.sum(x * x, axis=1, keepdims=True) * inv_b
    var = jnp.maximum(ex2 - mean * mean, 0.0)
    w = w_ref[...][None]                             # (1, 1, H)
    b = b_ref[...][None]
    scale = jax.lax.rsqrt(var + BN_EPS) * w          # (tt, 1, H)
    shift = b - mean * scale
    o_ref[...] = (x * scale + shift).astype(o_ref.dtype)


def _bn_3d_call(x, weight, bias, tile_target, vmem_limit):
    T, B, H = x.shape
    itemsize = jnp.dtype(x.dtype).itemsize
    sublane = 8 if itemsize >= 4 else (16 if itemsize == 2 else 32)
    # Padded VMEM bytes per time row.
    row_bytes = _round_up(B, sublane) * _round_up(H, 128) * itemsize
    tt = _choose_time_tile(T, row_bytes, tile_target, granularity=1)
    Tp = _round_up(T, tt)
    xp = x if Tp == T else jnp.pad(x, ((0, Tp - T), (0, 0), (0, 0)))

    w2 = weight.reshape(1, H).astype(jnp.float32)
    b2 = bias.reshape(1, H).astype(jnp.float32)
    grid = (Tp // tt,)
    kernel = functools.partial(_bn_3d_kernel, batch=B)

    cost = pl.CostEstimate(
        flops=8 * Tp * B * H,
        transcendentals=Tp * H,
        bytes_accessed=2 * Tp * B * H * itemsize + 2 * H * 4,
    )

    out = pl.pallas_call(
        kernel,
        out_shape=jax.ShapeDtypeStruct((Tp, B, H), x.dtype),
        grid_spec=pltpu.PrefetchScalarGridSpec(
            num_scalar_prefetch=0,
            grid=grid,
            in_specs=[
                pl.BlockSpec((tt, B, H), lambda i: (i, 0, 0)),
                pl.BlockSpec((1, H), lambda i: (0, 0)),
                pl.BlockSpec((1, H), lambda i: (0, 0)),
            ],
            out_specs=pl.BlockSpec((tt, B, H), lambda i: (i, 0, 0)),
        ),
        compiler_params=pltpu.CompilerParams(
            dimension_semantics=("parallel",),
            vmem_limit_bytes=vmem_limit,
        ),
        cost_estimate=cost,
    )(xp, w2, b2)
    return out[:T]


def batch_norm_step(x, weight, bias, bn_start0=0):
    """x: (T, B, H); weight, bias: (H,). Returns (T, B, H).

    bn_start0 only selects which running-stats buffer the PyTorch module would
    update; all per-step BN layers share weight/bias, so the forward output
    does not depend on it.
    """
    del bn_start0
    T, B, H = x.shape
    vmem_cap = _vmem_capacity_bytes()
    # ~8 MiB padded x tile on v5e/v6e (128 MiB VMEM), ~4 MiB on v7x (64 MiB);
    # vmem limit leaves headroom for double-buffering + constants.
    tile_target = min(8 * 1024 * 1024, vmem_cap // 16)
    vmem_limit = int(min(96 * 1024 * 1024, (vmem_cap * 3) // 4))

    seg_bytes = 2 * B * H * H * 4  # segment matrix + its transpose (f32)
    use_packed = (H % 128 != 0) and (seg_bytes <= 2 * 1024 * 1024)

    if use_packed:
        return _bn_packed_call(x, weight, bias, tile_target, vmem_limit)
    return _bn_3d_call(x, weight, bias, tile_target, vmem_limit)


def reference_bn_step(x, weight, bias):
    # Pure-JAX reference of the PyTorch forward (training-mode BatchNorm1d,
    # shared affine across all timesteps).
    xf = x.astype(jnp.float32)
    mean = jnp.mean(xf, axis=1, keepdims=True)
    var = jnp.mean((xf - mean) ** 2, axis=1, keepdims=True)
    y = (xf - mean) / jnp.sqrt(var + BN_EPS)
    return (y * weight[None, None, :] + bias[None, None, :]).astype(x.dtype)


if __name__ == "__main__":
    # Small shapes consistent with the module: seq=8, batch=8, hidden=32.
    seq_len, batch, hidden = 8, 8, 32
    key = jax.random.PRNGKey(0)
    kx, kw, kb = jax.random.split(key, 3)

    x = jax.random.normal(kx, (seq_len, batch, hidden), dtype=jnp.float32)
    # nn.BatchNorm1d default init is weight=1, bias=0; use deterministic
    # non-trivial values to exercise the affine path.
    weight = 1.0 + 0.1 * jax.random.normal(kw, (hidden,), dtype=jnp.float32)
    bias = 0.1 * jax.random.normal(kb, (hidden,), dtype=jnp.float32)

    out = batch_norm_step(x, weight, bias, bn_start0=0)
    out = jax.block_until_ready(out)

    ref = reference_bn_step(x, weight, bias)
    assert out.shape == (seq_len, batch, hidden)
    assert jnp.allclose(out, ref, atol=1e-4, rtol=1e-4)

    # TODO(synk): running_mean/running_var buffer updates (training-time side
    # effect selected by BN_start0, no influence on the forward output) are
    # not implemented.
    print("KERNEL_OK")
</pallas_src>

<mosaic_0001>
module attributes {stable_mosaic.version = 11 : i64} {
  func.func @_bn_packed_kernel(%arg0: i32, %arg1: memref<8x256xf32, #tpu.memory_space<vmem>>, %arg2: memref<1x32xf32, #tpu.memory_space<vmem>>, %arg3: memref<1x32xf32, #tpu.memory_space<vmem>>, %arg4: memref<256x32xf32, #tpu.memory_space<vmem>>, %arg5: memref<32x256xf32, #tpu.memory_space<vmem>>, %arg6: memref<8x256xf32, #tpu.memory_space<vmem>>) attributes {dimension_semantics = [#tpu.dimension_semantics<parallel>], iteration_bounds = array<i64: 1>, scalar_prefetch = 0 : i64, scratch_operands = 0 : i64, tpu.core_type = #tpu.core_type<tc>, window_params = [{transform_indices = @transform_0, window_bounds = array<i64: 8, 256>}, {pipeline_mode = #tpu.pipeline_mode<synchronous>, transform_indices = @transform_1, window_bounds = array<i64: 1, 32>}, {pipeline_mode = #tpu.pipeline_mode<synchronous>, transform_indices = @transform_2, window_bounds = array<i64: 1, 32>}, {pipeline_mode = #tpu.pipeline_mode<synchronous>, transform_indices = @transform_3, window_bounds = array<i64: 256, 32>}, {pipeline_mode = #tpu.pipeline_mode<synchronous>, transform_indices = @transform_4, window_bounds = array<i64: 32, 256>}, {transform_indices = @transform_5, window_bounds = array<i64: 8, 256>}]} {
    %c0 = arith.constant 0 : index
    %c0_0 = arith.constant 0 : index
    %0 = vector.load %arg1[%c0, %c0_0] : memref<8x256xf32, #tpu.memory_space<vmem>>, vector<8x256xf32>
    %c0_1 = arith.constant 0 : index
    %c0_2 = arith.constant 0 : index
    %1 = vector.load %arg4[%c0_1, %c0_2] : memref<256x32xf32, #tpu.memory_space<vmem>>, vector<256x32xf32>
    %c0_3 = arith.constant 0 : index
    %c0_4 = arith.constant 0 : index
    %2 = vector.load %arg5[%c0_3, %c0_4] : memref<32x256xf32, #tpu.memory_space<vmem>>, vector<32x256xf32>
    %cst = arith.constant dense<0.000000e+00> : vector<8x32xf32>
    %3 = tpu.matmul %0, %1, %cst {dimension_numbers = #tpu.dot_dimension_numbers<[1], [0], [0], [1], [0, 0, 1, 1], [], []>, precision = #tpu.contract_precision<fp32>} : vector<8x256xf32>, vector<256x32xf32>, vector<8x32xf32> -> vector<8x32xf32>
    %cst_5 = arith.constant 1.250000e-01 : f32
    %4 = vector.broadcast %cst_5 : f32 to vector<8x32xf32>
    %5 = arith.mulf %3, %4 : vector<8x32xf32>
    %6 = arith.mulf %0, %0 : vector<8x256xf32>
    %cst_6 = arith.constant dense<0.000000e+00> : vector<8x32xf32>
    %7 = tpu.matmul %6, %1, %cst_6 {dimension_numbers = #tpu.dot_dimension_numbers<[1], [0], [0], [1], [0, 0, 1, 1], [], []>, precision = #tpu.contract_precision<fp32>} : vector<8x256xf32>, vector<256x32xf32>, vector<8x32xf32> -> vector<8x32xf32>
    %cst_7 = arith.constant 1.250000e-01 : f32
    %8 = vector.broadcast %cst_7 : f32 to vector<8x32xf32>
    %9 = arith.mulf %7, %8 : vector<8x32xf32>
    %10 = arith.mulf %5, %5 : vector<8x32xf32>
    %11 = arith.subf %9, %10 : vector<8x32xf32>
    %cst_8 = arith.constant 0.000000e+00 : f32
    %12 = vector.broadcast %cst_8 : f32 to vector<8x32xf32>
    %13 = arith.maximumf %11, %12 : vector<8x32xf32>
    %c0_9 = arith.constant 0 : index
    %c0_10 = arith.constant 0 : index
    %14 = vector.load %arg2[%c0_9, %c0_10] : memref<1x32xf32, #tpu.memory_space<vmem>>, vector<1x32xf32>
    %c0_11 = arith.constant 0 : index
    %c0_12 = arith.constant 0 : index
    %15 = vector.load %arg3[%c0_11, %c0_12] : memref<1x32xf32, #tpu.memory_space<vmem>>, vector<1x32xf32>
    %cst_13 = arith.constant 9.99999974E-6 : f32
    %16 = vector.broadcast %cst_13 : f32 to vector<8x32xf32>
    %17 = arith.addf %13, %16 : vector<8x32xf32>
    %18 = math.rsqrt %17 : vector<8x32xf32>
    %19 = vector.broadcast %14 : vector<1x32xf32> to vector<8x32xf32>
    %20 = arith.mulf %18, %19 : vector<8x32xf32>
    %21 = arith.mulf %5, %20 : vector<8x32xf32>
    %22 = vector.broadcast %15 : vector<1x32xf32> to vector<8x32xf32>
    %23 = arith.subf %22, %21 : vector<8x32xf32>
    %cst_14 = arith.constant dense<0.000000e+00> : vector<8x256xf32>
    %24 = tpu.matmul %20, %2, %cst_14 {dimension_numbers = #tpu.dot_dimension_numbers<[1], [0], [0], [1], [0, 0, 1, 1], [], []>, precision = #tpu.contract_precision<fp32>} : vector<8x32xf32>, vector<32x256xf32>, vector<8x256xf32> -> vector<8x256xf32>
    %cst_15 = arith.constant dense<0.000000e+00> : vector<8x256xf32>
    %25 = tpu.matmul %23, %2, %cst_15 {dimension_numbers = #tpu.dot_dimension_numbers<[1], [0], [0], [1], [0, 0, 1, 1], [], []>, precision = #tpu.contract_precision<fp32>} : vector<8x32xf32>, vector<32x256xf32>, vector<8x256xf32> -> vector<8x256xf32>
    %26 = arith.mulf %0, %24 : vector<8x256xf32>
    %27 = arith.addf %26, %25 : vector<8x256xf32>
    %c0_16 = arith.constant 0 : index
    %c0_17 = arith.constant 0 : index
    %28 = vector.load %arg6[%c0_16, %c0_17] : memref<8x256xf32, #tpu.memory_space<vmem>>, vector<8x256xf32>
    tpu.vector_store %arg6[%c0_16, %c0_17], %27 {strides = array<i32>} : memref<8x256xf32, #tpu.memory_space<vmem>>, vector<8x256xf32>,
    return
  }
  func.func @transform_0(%arg0: i32) -> (i32, i32) {
    %c0_i32 = arith.constant 0 : i32
    %c0_i32_0 = arith.constant 0 : i32
    return %arg0, %c0_i32 : i32, i32
  }
  func.func @transform_1(%arg0: i32) -> (i32, i32) {
    %c0_i32 = arith.constant 0 : i32
    %c0_i32_0 = arith.constant 0 : i32
    %c0_i32_1 = arith.constant 0 : i32
    return %c0_i32, %c0_i32_0 : i32, i32
  }
  func.func @transform_2(%arg0: i32) -> (i32, i32) {
    %c0_i32 = arith.constant 0 : i32
    %c0_i32_0 = arith.constant 0 : i32
    %c0_i32_1 = arith.constant 0 : i32
    return %c0_i32, %c0_i32_0 : i32, i32
  }
  func.func @transform_3(%arg0: i32) -> (i32, i32) {
    %c0_i32 = arith.constant 0 : i32
    %c0_i32_0 = arith.constant 0 : i32
    %c0_i32_1 = arith.constant 0 : i32
    return %c0_i32, %c0_i32_0 : i32, i32
  }
  func.func @transform_4(%arg0: i32) -> (i32, i32) {
    %c0_i32 = arith.constant 0 : i32
    %c0_i32_0 = arith.constant 0 : i32
    %c0_i32_1 = arith.constant 0 : i32
    return %c0_i32, %c0_i32_0 : i32, i32
  }
  func.func @transform_5(%arg0: i32) -> (i32, i32) {
    %c0_i32 = arith.constant 0 : i32
    %c0_i32_0 = arith.constant 0 : i32
    return %arg0, %c0_i32 : i32, i32
  }
}

</mosaic_0001>

<bundles_post_ra>
// kernel: tpu_custom_call.1
= control target key start
LH: loop header
LB: loop body
LE: loop exit
PB: predicated region body
PF: predicated region fallthrough
CT: control target
= control target key end

     0   :  { %s5021_s0 = inlined_call_operand.vmem [shape: f32[8,256], index: 0, kind: input, shape index: {}]   ;;  %s5022_s1 = inlined_call_operand.vmem [shape: f32[1,32], index: 1, kind: input, shape index: {}]   ;;  %s5023_s2 = inlined_call_operand.vmem [shape: f32[1,32], index: 2, kind: input, shape index: {}]   ;;  %s5024_s3 = inlined_call_operand.vmem [shape: f32[256,32], index: 3, kind: input, shape index: {}]   ;;  %s5025_s4 = inlined_call_operand.vmem [shape: f32[32,256], index: 4, kind: input, shape index: {}]   ;;  %s5026_s5 = inlined_call_operand.hbm [shape: f32[8,256], index: 5, kind: output, shape index: {}]  }
   0x1   :  { %v39_v0 = vld [vmem:[%s5024_s3 + $0x80] sm:$0xff]  ;;  %v40_v1 = vld [vmem:[%s5024_s3 + $0x88] sm:$0xff]  ;;  %v41_v7 = vld [vmem:[%s5024_s3 + $0x90] sm:$0xff] }
   0x2   :  { %v23_v2 = vld [vmem:[%s5024_s3] sm:$0xff]  ;;  %v112_v3 = vand.u32 4294901760, %v39_v0  ;;  %v115_v4 = vand.u32 4294901760, %v40_v1  ;;  %v24_v5 = vld [vmem:[%s5024_s3 + $0x8] sm:$0xff]  ;;  %v42_v8 = vld [vmem:[%s5024_s3 + $0x98] sm:$0xff]  ;;  %v118_v10 = vand.u32 4294901760, %v41_v7 }
   0x3   :  { %v64_v6 = vand.u32 4294901760, %v23_v2  ;;  %v67_v9 = vand.u32 4294901760, %v24_v5  ;;  %v121_v11 = vand.u32 4294901760, %v42_v8  ;;  %v25_v12 = vld [vmem:[%s5024_s3 + $0x10] sm:$0xff]  ;;  %v26_v13 = vld [vmem:[%s5024_s3 + $0x18] sm:$0xff]  ;;  %v3936_v14 = vld [vmem:[%s5024_s3 + $0xa0] sm:$0xff] }
   0x4   :  { %v3938_v15 = vpack.c.bf16 %v115_v4, %v112_v3  ;;  %v70_v16 = vand.u32 4294901760, %v25_v12  ;;  %v73_v17 = vand.u32 4294901760, %v26_v13  ;;  %v3943_v18 = vld [vmem:[%s5024_s3 + $0xa8] sm:$0xff]  ;;  %v124_v19 = vand.u32 4294901760, %v3936_v14  ;;  %v3949_v20 = vld [vmem:[%s5024_s3 + $0x20] sm:$0xff]  ;;  %v3966_v26 = vld [vmem:[%s5024_s3 + $0xb0] sm:$0xff] }
   0x5   :  { %v3954_v21 = vld [vmem:[%s5024_s3 + $0x28] sm:$0xff]  ;;  %v3956_v22 = vpack.c.bf16 %v67_v9, %v64_v6  ;;  %v3958_v23 = vpack.c.bf16 %v121_v11, %v118_v10  ;;  %v127_v24 = vand.u32 4294901760, %v3943_v18  ;;  %v3961_v25 = vsub.f32 %v39_v0, %v112_v3  ;;  %v3971_v27 = vld [vmem:[%s5024_s3 + $0xb8] sm:$0xff]  ;;  %v3995_v36 = vld [vmem:[%s5024_s3 + $0x30] sm:$0xff] }
   0x6   :  { %3349 = vmatprep.subr.bf16.mxu0 %v3938_v15  ;;  %v3974_v28 = vpack.c.bf16 %v73_v17, %v70_v16  ;;  %v3976_v29 = vsub.f32 %v40_v1, %v115_v4  ;;  %v76_v30 = vand.u32 4294901760, %v3949_v20  ;;  %v79_v31 = vand.u32 4294901760, %v3954_v21  ;;  %v4017_v45 = vld [vmem:[%s5024_s3 + $0x38] sm:$0xff]  ;;  %v4047_v58 = vld [vmem:[%s5024_s3 + $0xc0] sm:$0xff] }
   0x7   :  { %3351 = vmatpush3.bf16.msra.mxu0 %v3956_v22  ;;  %v3985_v32 = vpack.c.bf16 %v127_v24, %v124_v19  ;;  %v5040_v33 = vand.u32 4294901760, %v3961_v25  ;;  %v3988_v34 = vsub.f32 %v23_v2, %v64_v6  ;;  %v3990_v35 = vsub.f32 %v24_v5, %v67_v9 }
   0x8   :  { %3353 = vmatprep.subr.bf16.mxu0 %v3958_v23  ;;  %v5039_v37 = vand.u32 4294901760, %v3976_v29  ;;  %v4003_v38 = vpack.c.bf16 %v79_v31, %v76_v30  ;;  %v130_v39 = vand.u32 4294901760, %v3966_v26  ;;  %v133_v40 = vand.u32 4294901760, %v3971_v27 }
   0x9   :  { %v291_v41 = vsub.f32 %v3961_v25, %v5040_v33  ;;  %v5036_v42 = vand.u32 4294901760, %v3988_v34  ;;  %v5035_v43 = vand.u32 4294901760, %v3990_v35  ;;  %v4012_v44 = vsub.f32 %v41_v7, %v118_v10 }
   0xa   :  { %v298_v46 = vsub.f32 %v3976_v29, %v5039_v37  ;;  %v4026_v47 = vpack.c.bf16 %v133_v40, %v130_v39  ;;  %v4028_v48 = vsub.f32 %v42_v8, %v121_v11  ;;  %v82_v49 = vand.u32 4294901760, %v3995_v36 }
   0xb   :  { %3355 = vmatpush3.bf16.msra.mxu0 %v3974_v28  ;;  %v292_v50 = vand.u32 4294901760, %v291_v41  ;;  %v179_v51 = vsub.f32 %v3988_v34, %v5036_v42  ;;  %v186_v52 = vsub.f32 %v3990_v35, %v5035_v43  ;;  %v5034_v53 = vand.u32 4294901760, %v4012_v44 }
   0xc   :  { %3357 = vmatprep.subr.bf16.mxu0 %v3985_v32  ;;  %v299_v54 = vand.u32 4294901760, %v298_v46  ;;  %v5033_v55 = vand.u32 4294901760, %v4028_v48  ;;  %v85_v56 = vand.u32 4294901760, %v4017_v45  ;;  %v4042_v57 = vsub.f32 %v25_v12, %v70_v16 }
   0xd   :  { %10 = vsyncpa [#allocation3], 0  ;;  %v180_v59 = vand.u32 4294901760, %v179_v51  ;;  %v187_v60 = vand.u32 4294901760, %v186_v52  ;;  %v305_v61 = vsub.f32 %v4012_v44, %v5034_v53  ;;  %v4052_v62 = vsub.f32 %v26_v13, %v73_v17  ;;  %v4057_v63 = vld [vmem:[%s5024_s3 + $0xc8] sm:$0xff]  ;;  %v4074_v4 = vld [vmem:[%s5024_s3 + $0x40] sm:$0xff] }
   0xe   :  { %v4059_v0 = vpack.c.bf16 %v299_v54, %v292_v50  ;;  %v312_v1 = vsub.f32 %v4028_v48, %v5033_v55  ;;  %v4068_v2 = vpack.c.bf16 %v85_v56, %v82_v49  ;;  %v5030_v3 = vand.u32 4294901760, %v4042_v57  ;;  %v4079_v5 = vld [vmem:[%s5024_s3 + $0x48] sm:$0xff] }
   0xf   :  { %3359 = vmatpush3.bf16.msra.mxu0 %v4003_v38  ;;  %v4082_v6 = vpack.c.bf16 %v187_v60, %v180_v59  ;;  %v306_v7 = vand.u32 4294901760, %v305_v61  ;;  %v5029_v8 = vand.u32 4294901760, %v4052_v62  ;;  %v136_v9 = vand.u32 4294901760, %v4047_v58 }
  0x10   :  { %5094 = vst [vmem:[#allocation5_spill] sm:$0xff] %v4059_v0  ;;  %3381 = vmatprep.subr.bf16.mxu1 %v4059_v0  ;;  %3361 = vmatprep.subr.bf16.mxu0 %v4026_v47  ;;  %v313_v10 = vand.u32 4294901760, %v312_v1  ;;  %v193_v11 = vsub.f32 %v4042_v57, %v5030_v3  ;;  %v139_v12 = vand.u32 4294901760, %v4057_v63  ;;  %v4095_v13 = vsub.f32 %v3936_v14, %v124_v19  ;;  %v4111_v14 = vld [vmem:[%s5024_s3 + $0xd0] sm:$0xff]  ;;  %v4116_v19 = vld [vmem:[%s5024_s3 + $0xd8] sm:$0xff] }
  0x11   :  { %5095 = vst [vmem:[#allocation6_spill] sm:$0xff] %v4082_v6  ;;  %3383 = vmatpush3.bf16.msra.mxu1 %v4082_v6  ;;  %v200_v16 = vsub.f32 %v4052_v62, %v5029_v8  ;;  %v4104_v17 = vsub.f32 %v3943_v18, %v127_v24  ;;  %v88_v41 = vand.u32 4294901760, %v4074_v4  ;;  %v91_v46 = vand.u32 4294901760, %v4079_v5 }
  0x12   :  { %v4118_v50 = vpack.c.bf16 %v313_v10, %v306_v7  ;;  %v194_v51 = vand.u32 4294901760, %v193_v11  ;;  %v4124_v18 = vpack.c.bf16 %v139_v12, %v136_v9  ;;  %v5027_v24 = vand.u32 4294901760, %v4095_v13 }
  0x13   :  { %3363 = vmatpush3.bf16.msra.mxu0 %v4068_v2  ;;  %v201_v52 = vand.u32 4294901760, %v200_v16  ;;  %v5028_v54 = vand.u32 4294901760, %v4104_v17  ;;  %v4133_v59 = vpack.c.bf16 %v91_v46, %v88_v41  ;;  %v4138_v60 = vsub.f32 %v3949_v20, %v76_v30  ;;  %v4155_v20 = vld [vmem:[%s5024_s3 + $0x50] sm:$0xff] }
  0x14   :  { %5096 = vst [vmem:[#allocation7_spill] sm:$0xff] %v4118_v50  ;;  %3385 = vmatprep.subr.bf16.mxu1 %v4118_v50  ;;  %3365 = vmatprep.subr.bf16.mxu0 %v4124_v18  ;;  %v319_v61 = vsub.f32 %v4095_v13, %v5027_v24  ;;  %v4148_v1 = vsub.f32 %v3954_v21, %v79_v31  ;;  %v5051_v7 = vand.u32 4294901760, %v4111_v14  ;;  %v5047_v10 = vand.u32 4294901760, %v4116_v19  ;;  %v4171_v31 = vld [vmem:[%s5024_s3 + $0x58] sm:$0xff] }
  0x15   :  { %v4157_v30 = vpack.c.bf16 %v201_v52, %v194_v51  ;;  %v326_v11 = vsub.f32 %v4104_v17, %v5028_v54  ;;  %v5031_v16 = vand.u32 4294901760, %v4138_v60  ;;  %v4166_v21 = vsub.f32 %v3966_v26, %v130_v39 }
  0x16   :  { %v320_v24 = vand.u32 4294901760, %v319_v61  ;;  %v5032_v51 = vand.u32 4294901760, %v4148_v1  ;;  %v4178_v52 = vpack.c.bf16 %v5047_v10, %v5051_v7  ;;  %v4183_v54 = vsub.f32 %v3971_v27, %v133_v40 }
  0x17   :  { %5097 = vst [vmem:[#allocation8_spill] sm:$0xff] %v4157_v30  ;;  %3387 = vmatpush3.bf16.msra.mxu1 %v4157_v30  ;;  %v327_v26 = vand.u32 4294901760, %v326_v11  ;;  %3367 = vmatpush3.bf16.msra.mxu0 %v4133_v59  ;;  %v207_v39 = vsub.f32 %v4138_v60, %v5031_v16  ;;  %v5038_v61 = vand.u32 4294901760, %v4166_v21  ;;  %v5042_v8 = vand.u32 4294901760, %v4155_v20  ;;  %v4206_v16 = vld [vmem:[%s5024_s3 + $0xe0] sm:$0xff] }
  0x18   :  { %v214_v3 = vsub.f32 %v4148_v1, %v5032_v51  ;;  %3369 = vmatprep.subr.bf16.mxu0 %v4178_v52  ;;  %v5037_v27 = vand.u32 4294901760, %v4183_v54  ;;  %v5041_v40 = vand.u32 4294901760, %v4171_v31  ;;  %v4201_v11 = vsub.f32 %v3995_v36, %v82_v49  ;;  %v4211_v51 = vld [vmem:[%s5024_s3 + $0xe8] sm:$0xff] }
  0x19   :  { %v4213_v55 = vpack.c.bf16 %v327_v26, %v320_v24  ;;  %v208_v53 = vand.u32 4294901760, %v207_v39  ;;  %v333_v43 = vsub.f32 %v4166_v21, %v5038_v61  ;;  %v4221_v36 = vsub.f32 %v4017_v45, %v85_v56  ;;  %v4236_v39 = vld [vmem:[%s5024_s3 + $0x60] sm:$0xff]  ;;  %v4245_v61 = vld [vmem:[%s5024_s3 + $0x68] sm:$0xff] }
  0x1a   :  { %v215_v49 = vand.u32 4294901760, %v214_v3  ;;  %v340_v42 = vsub.f32 %v4183_v54, %v5037_v27  ;;  %v4230_v24 = vpack.c.bf16 %v5041_v40, %v5042_v8  ;;  %v5044_v26 = vand.u32 4294901760, %v4201_v11 }
  0x1b   :  { %5098 = vst [vmem:[#allocation9_spill] sm:$0xff] %v4213_v55  ;;  %3389 = vmatprep.subr.bf16.mxu1 %v4213_v55  ;;  %v334_v45 = vand.u32 4294901760, %v333_v43  ;;  %v5043_v56 = vand.u32 4294901760, %v4221_v36  ;;  %v5046_v3 = vand.u32 4294901760, %v4206_v16  ;;  %v5045_v27 = vand.u32 4294901760, %v4211_v51 }
  0x1c   :  { %v4247_v37 = vpack.c.bf16 %v215_v49, %v208_v53  ;;  %v341_v33 = vand.u32 4294901760, %v340_v42  ;;  %3371 = vmatpush3.bf16.msra.mxu0 %v4230_v24  ;;  %v221_v43 = vsub.f32 %v4201_v11, %v5044_v26  ;;  %v4256_v40 = vsub.f32 %v4047_v58, %v136_v9  ;;  %v4276_v58 = vld [vmem:[%s5024_s3 + $0xf0] sm:$0xff]  ;;  %v4281_v9 = vld [vmem:[%s5024_s3 + $0xf8] sm:$0xff] }
  0x1d   :  { %v228_v8 = vsub.f32 %v4221_v36, %v5043_v56  ;;  %v4265_v42 = vpack.c.bf16 %v5045_v27, %v5046_v3  ;;  %v4270_v53 = vsub.f32 %v4057_v63, %v139_v12  ;;  %v5050_v49 = vand.u32 4294901760, %v4236_v39 }
  0x1e   :  { %5099 = vst [vmem:[#allocation10_spill] sm:$0xff] %v4247_v37  ;;  %3391 = vmatpush3.bf16.msra.mxu1 %v4247_v37  ;;  %v4284_v56 = vpack.c.bf16 %v341_v33, %v334_v45  ;;  %v222_v26 = vand.u32 4294901760, %v221_v43  ;;  %v5048_v63 = vand.u32 4294901760, %v4256_v40  ;;  %v5049_v12 = vand.u32 4294901760, %v4245_v61 }
  0x1f   :  { %5100 = vst [vmem:[#allocation11_spill] sm:$0xff] %v4265_v42  ;;  %v229_v27 = vand.u32 4294901760, %v228_v8  ;;  %3373 = vmatprep.subr.bf16.mxu0 %v4265_v42  ;;  %v5052_v3 = vand.u32 4294901760, %v4270_v53  ;;  %v4293_v10 = vsub.f32 %v4074_v4, %v88_v41  ;;  %v4298_v33 = vsub.f32 %v4079_v5, %v91_v46  ;;  %v4315_v5 = vld [vmem:[%s5024_s3 + $0x70] sm:$0xff] }
  0x20   :  { %5101 = vst [vmem:[#allocation12_spill] sm:$0xff] %v4284_v56  ;;  %3393 = vmatprep.subr.bf16.mxu1 %v4284_v56  ;;  %v347_v8 = vsub.f32 %v4256_v40, %v5048_v63  ;;  %v4308_v45 = vpack.c.bf16 %v5049_v12, %v5050_v49  ;;  %v5056_v4 = vand.u32 4294901760, %v4276_v58  ;;  %v5055_v41 = vand.u32 4294901760, %v4281_v9  ;;  %v4327_v49 = vld [vmem:[%s5024_s3 + $0x78] sm:$0xff] }
  0x21   :  { %v4317_v46 = vpack.c.bf16 %v229_v27, %v222_v26  ;;  %v354_v43 = vsub.f32 %v4270_v53, %v5052_v3  ;;  %v5105_v26 = vand.u32 4294901760, %v4111_v14  ;;  %v5106_v12 = vand.u32 4294901760, %v4116_v19 }
  0x22   :  { %5102 = vst [vmem:[#allocation13_spill] sm:$0xff] %v4308_v45  ;;  %v348_v7 = vand.u32 4294901760, %v347_v8  ;;  %3375 = vmatpush3.bf16.msra.mxu0 %v4308_v45  ;;  %v4334_v27 = vpack.c.bf16 %v5055_v41, %v5056_v4  ;;  %v5107_v56 = vand.u32 4294901760, %v4293_v10  ;;  %v5108_v41 = vand.u32 4294901760, %v4298_v33 }
  0x23   :  { %5103 = vst [vmem:[#allocation14_spill] sm:$0xff] %v4317_v46  ;;  %v4339_v3 = vsub.f32 %v4111_v14, %v5105_v26  ;;  %v4344_v63 = vsub.f32 %v4116_v19, %v5106_v12  ;;  %3395 = vmatpush3.bf16.msra.mxu1 %v4317_v46  ;;  %v355_v8 = vand.u32 4294901760, %v354_v43  ;;  %v109_v12 = vand.u32 4294901760, %v4327_v49 }
  0x24   :  { %5104 = vst [vmem:[#allocation15_spill] sm:$0xff] %v4334_v27  ;;  %v235_v37 = vsub.f32 %v4293_v10, %v5107_v56  ;;  %v242_v4 = vsub.f32 %v4298_v33, %v5108_v41  ;;  %3377 = vmatprep.subr.bf16.mxu0 %v4334_v27  ;;  %v5109_v43 = vand.u32 4294901760, %v4155_v20  ;;  %v4366_v56 = vld [vmem:[%s5021_s0 + $0x8] sm:$0xff]  ;;  %v5112_v14 = vand.u32 4294901760, %v4171_v31 }
  0x25   :  { %5110 = vst [vmem:[#allocation16_spill] sm:$0xff] %v4366_v56  ;;  %v4368_v41 = vpack.c.bf16 %v355_v8, %v348_v7  ;;  %v5113_v30 = vand.u32 4294901760, %v4339_v3  ;;  %v5115_v6 = vand.u32 4294901760, %v4315_v5  ;;  %v5125_v27 = vand.u32 4294901760, %v4236_v39 }
  0x26   :  { %v4361_v26 = vsub.f32 %v4155_v20, %v5109_v43  ;;  %v236_v55 = vand.u32 4294901760, %v235_v37  ;;  %v243_v46 = vand.u32 4294901760, %v242_v4  ;;  %v4373_v19 = vsub.f32 %v4171_v31, %v5112_v14 }
  0x27   :  { %5111 = vst [vmem:[#allocation17_spill] sm:$0xff] %v4368_v41  ;;  %v361_v50 = vsub.f32 %v4339_v3, %v5113_v30  ;;  %v5114_v20 = vand.u32 4294901760, %v4344_v63  ;;  %v4383_v0 = vpack.c.bf16 %v109_v12, %v5115_v6  ;;  %3397 = vmatprep.subr.bf16.mxu1 %v4368_v41  ;;  %v4391_v4 = vand.u32 4294901760, %v4366_v56  ;;  %v4401_v6 = vld [vmem:[%s5021_s0] sm:$0xff] }
  0x28   :  { %v5063_v37 = vand.u32 4294901760, %v4361_v26  ;;  %v4387_v7 = vpack.c.bf16 %v243_v46, %v236_v55  ;;  %v5119_v30 = vand.u32 4294901760, %v4206_v16  ;;  %5120 = vst [vmem:[#allocation21_spill] sm:$0xff] %v4401_v6  ;;  %v5121_v46 = vand.u32 4294901760, %v4211_v51 }
  0x29   :  { %v368_v43 = vsub.f32 %v4344_v63, %v5114_v20  ;;  %5116 = vst [vmem:[#allocation18_spill] sm:$0xff] %v4383_v0  ;;  %5118 = vst [vmem:[#allocation20_spill] sm:$0xff] %v4391_v4  ;;  %v362_v14 = vand.u32 4294901760, %v361_v50  ;;  %3379 = vmatpush3.bf16.msra.mxu0 %v4383_v0  ;;  %v4418_v50 = vsub.f32 %v4366_v56, %v4391_v4  ;;  %400 = vmatprep.mubr.f32.mxu1 %v4391_v4  ;;  %vm1813_vm0 = vcmask 261120  }
  0x2a   :  { %5117 = vst [vmem:[#allocation19_spill] sm:$0xff] %v4387_v7  ;;  %v4396_v8 = vsub.f32 %v4206_v16, %v5119_v30  ;;  %v249_v55 = vsub.f32 %v4361_v26, %v5063_v37  ;;  %v4410_v31 = vsub.f32 %v4211_v51, %v5121_v46  ;;  %3399 = vmatpush3.bf16.msra.mxu1 %v4387_v7  ;;  %v5122_v16 = vand.u32 4294901760, %v4373_v19 }
  0x2b   :  { %v369_v20 = vand.u32 4294901760, %v368_v43  ;;  %v4423_v37 = vpack.c.bf16 %v3976_v29, %v3961_v25  ;;  %v4430_v41 = vand.u32 4294901760, %v4401_v6  ;;  %v5129_v4 = vand.u32 4294901760, %v4276_v58 }
  0x2c   :  { %v256_v30 = vsub.f32 %v4373_v19, %v5122_v16  ;;  %v5071_v43 = vand.u32 4294901760, %v4396_v8  ;;  %v250_v46 = vand.u32 4294901760, %v249_v55  ;;  %v5076_v7 = vand.u32 4294901760, %v4410_v31 }
  0x2d   :  { %5123 = vst [vmem:[#allocation22_spill] sm:$0xff] %v4423_v37  ;;  %v4426_v51 = vpack.c.bf16 %v369_v20, %v362_v14  ;;  %3413 = vmatprep.subr.bf16.mxu0 %v4423_v37  ;;  %v4440_v14 = vsub.f32 %v4236_v39, %v5125_v27  ;;  %v4448_v55 = vsub.f32 %v4401_v6, %v4430_v41  ;;  %v5128_v39 = vand.u32 4294901760, %v4418_v50 }
  0x2e   :  { %v257_v16 = vand.u32 4294901760, %v256_v30  ;;  %v375_v0 = vsub.f32 %v4396_v8, %v5071_v43  ;;  %v382_v20 = vsub.f32 %v4410_v31, %v5076_v7  ;;  %v5126_v30 = vand.u32 4294901760, %v4245_v61 }
  0x2f   :  { %5124 = vst [vmem:[#allocation23_spill] sm:$0xff] %v4426_v51  ;;  %3401 = vmatprep.subr.bf16.mxu1 %v4426_v51  ;;  %v162_v27 = vsub.f32 %v4418_v50, %v5128_v39  ;;  %v5083_v51 = vand.u32 4294901760, %v4440_v14  ;;  %v5090_v7 = vand.u32 4294901760, %v4448_v55  ;;  %v4466_v42 = vsub.f32 %v4276_v58, %v5129_v4 }
  0x30   :  { %v4453_v43 = vsub.f32 %v4245_v61, %v5126_v30  ;;  %v4455_v56 = vpack.c.bf16 %v257_v16, %v250_v46  ;;  %v376_v37 = vand.u32 4294901760, %v375_v0  ;;  %v383_v45 = vand.u32 4294901760, %v382_v20 }
  0x31   :  { %v163_v61 = vand.u32 4294901760, %v162_v27  ;;  %v263_v46 = vsub.f32 %v4440_v14, %v5083_v51  ;;  %v4474_v0 = vpack.c.bf16 %v3990_v35, %v3988_v34  ;;  %v5130_v16 = vand.u32 4294901760, %v4281_v9 }
  0x32   :  { %5127 = vst [vmem:[#allocation24_spill] sm:$0xff] %v4455_v56  ;;  %v5085_v6 = vand.u32 4294901760, %v4453_v43  ;;  %3403 = vmatpush3.bf16.msra.mxu1 %v4455_v56  ;;  %v4481_v30 = vpack.c.bf16 %v383_v45, %v376_v37  ;;  %v168_v58 = vsub.f32 %v4448_v55, %v5090_v7  ;;  %v5086_v39 = vand.u32 4294901760, %v4466_v42 }
  0x33   :  { %v4479_v20 = vsub.f32 %v4281_v9, %v5130_v16  ;;  %164 = vmatprep.mubr.f32.mxu0 %v163_v61  ;;  %v264_v27 = vand.u32 4294901760, %v263_v46  ;;  %v5131_v56 = vand.u32 4294901760, %v4315_v5  ;;  %v4497_v45 = vsub.f32 %v4327_v49, %v109_v12 }
  0x34   :  { %v270_v4 = vsub.f32 %v4453_v43, %v5085_v6  ;;  %3405 = vmatprep.subr.bf16.mxu1 %v4481_v30  ;;  %v169_v37 = vand.u32 4294901760, %v168_v58  ;;  %v389_v6 = vsub.f32 %v4466_v42, %v5086_v39  ;;  %v4505_v61 = vpack.c.bf16 %v4028_v48, %v4012_v44 }
  0x35   :  { %v5087_v51 = vand.u32 4294901760, %v4479_v20  ;;  %v4494_v9 = vsub.f32 %v4315_v5, %v5131_v56  ;;  %v5088_v49 = vand.u32 4294901760, %v4497_v45  ;;  %v5134_v7 = vand.u32 4294901760, %v3961_v25 }
  0x36   :  { %v271_v16 = vand.u32 4294901760, %v270_v4  ;;  %170 = vmatmul.mubr.f32.vlgmr.msra.gmra.mrb[0].mxu0 %v169_v37  ;;  %v390_v46 = vand.u32 4294901760, %v389_v6  ;;  %v4530_v6 = vpack.c.bf16 %v4104_v17, %v4095_v13  ;;  %v5140_v25 = vand.u32 4294901760, %v4042_v57 }
  0x37   :  { %v396_v5 = vsub.f32 %v4479_v20, %v5087_v51  ;;  %v5089_v56 = vand.u32 4294901760, %v4494_v9  ;;  %3415 = vmatpush3.bf16.msra.mxu0 %v4474_v0  ;;  %v284_v39 = vsub.f32 %v4497_v45, %v5088_v49  ;;  %v4523_v51 = vpack.c.bf16 %v4052_v62, %v4042_v57  ;;  %537 = vmatprep.mubr.f32.mxu0 %v4418_v50 }
  0x38   :  { %v4512_v12 = vpack.c.bf16 %v271_v16, %v264_v27  ;;  %3417 = vmatprep.subr.bf16.mxu0 %v4505_v61  ;;  %v4540_v49 = vpack.c.bf16 %v4183_v54, %v4166_v21  ;;  %v5147_v57 = vand.u32 4294901760, %v4183_v54  ;;  %v4612_v54 = vpack.c.bf16 %v4221_v36, %v4201_v11 }
  0x39   :  { %v397_v58 = vand.u32 4294901760, %v396_v5  ;;  %v277_v4 = vsub.f32 %v4494_v9, %v5089_v56  ;;  %v285_v16 = vand.u32 4294901760, %v284_v39  ;;  %v4536_v5 = vpack.c.bf16 %v4148_v1, %v4138_v60 }
  0x3a   :  { %5132 = vst [vmem:[#allocation25_spill] sm:$0xff] %v4512_v12  ;;  %3407 = vmatpush3.bf16.msra.mxu1 %v4512_v12  ;;  %v5136_v39 = vand.u32 4294901760, %v3988_v34  ;;  %v5142_v34 = vand.u32 4294901760, %v4095_v13  ;;  %v5148_v13 = vand.u32 4294901760, %v4201_v11  ;;  %v4627_v11 = vpack.c.bf16 %v4298_v33, %v4293_v10 }
  0x3b   :  { %v4532_v27 = vpack.c.bf16 %v397_v58, %v390_v46  ;;  %v278_v37 = vand.u32 4294901760, %v277_v4  ;;  %3419 = vmatpush3.bf16.msra.mxu0 %v4523_v51  ;;  %v5135_v46 = vand.u32 4294901760, %v3976_v29  ;;  %v5137_v4 = vand.u32 4294901760, %v3990_v35 }
  0x3c   :  { %3421 = vmatprep.subr.bf16.mxu0 %v4530_v6  ;;  %v5141_v29 = vand.u32 4294901760, %v4052_v62  ;;  %v5143_v35 = vand.u32 4294901760, %v4104_v17  ;;  %v5149_v17 = vand.u32 4294901760, %v4221_v36  ;;  %v4632_v36 = vpack.c.bf16 %v4344_v63, %v4339_v3 }
  0x3d   :  { %5133 = vst [vmem:[#allocation26_spill] sm:$0xff] %v4532_v27  ;;  %3409 = vmatprep.subr.bf16.mxu1 %v4532_v27  ;;  %v4543_v56 = vpack.c.bf16 %v285_v16, %v278_v37  ;;  %v4550_v58 = vpack.c.bf16 %v5135_v46, %v5134_v7  ;;  %v4556_v12 = vpack.c.bf16 %v5137_v4, %v5136_v39  ;;  %v5138_v27 = vand.u32 4294901760, %v4012_v44 }
  0x3e   :  { %v5139_v37 = vand.u32 4294901760, %v4028_v48  ;;  %v4569_v7 = vpack.c.bf16 %v5141_v29, %v5140_v25  ;;  %v4575_v46 = vpack.c.bf16 %v5143_v35, %v5142_v34  ;;  %v5144_v39 = vand.u32 4294901760, %v4138_v60 }
  0x3f   :  { %v5145_v44 = vand.u32 4294901760, %v4148_v1  ;;  %3411 = vmatpush3.bf16.msra.mxu1 %v4543_v56  ;;  %v5146_v48 = vand.u32 4294901760, %v4166_v21  ;;  %v5150_v60 = vand.u32 4294901760, %v4256_v40  ;;  %v5151_v1 = vand.u32 4294901760, %v4270_v53  ;;  %3423 = vmatpush3.bf16.msra.mxu0 %v4536_v5 }
  0x40   :  { %v4563_v16 = vpack.c.bf16 %v5139_v37, %v5138_v27  ;;  %v4594_v27 = vpack.c.bf16 %v5149_v17, %v5148_v13  ;;  %v5153_v25 = vand.u32 4294901760, %v4293_v10  ;;  %v5154_v21 = vand.u32 4294901760, %v4298_v33  ;;  %3445 = vmatprep.subr.bf16.mxu1 %v3938_v15  ;;  %3425 = vmatprep.subr.bf16.mxu0 %v4540_v49  ;;  %v5160_v13 = vld [vmem:[#allocation18_spill] sm:$0xff]  ;;  %v5161_v17 = vld [vmem:[#allocation16_spill] sm:$0xff] }
  0x41   :  { %v4581_v4 = vpack.c.bf16 %v5145_v44, %v5144_v39  ;;  %v4588_v62 = vpack.c.bf16 %v5147_v57, %v5146_v48  ;;  %v4600_v37 = vpack.c.bf16 %v5151_v1, %v5150_v60  ;;  %v4618_v34 = vpack.c.bf16 %v4270_v53, %v4256_v40  ;;  %v5156_v39 = vld [vmem:[#allocation11_spill] sm:$0xff]  ;;  %v5157_v44 = vld [vmem:[#allocation20_spill] sm:$0xff]  ;;  %v5158_v48 = vld [vmem:[#allocation13_spill] sm:$0xff] }
  0x42   :  { %v4606_v29 = vpack.c.bf16 %v5154_v21, %v5153_v25  ;;  %402 = vmatmul.mubr.f32.vlgmr.msra.gmra.mrb[0].mxu1 %v4430_v41  ;;  %v5155_v35 = vand.u32 4294901760, %v4418_v50  ;;  %v4639_v40 = vpack.c.bf16 %v4373_v19, %v4361_v26  ;;  %v4644_v10 = vpack.c.bf16 %v4410_v31, %v4396_v8  ;;  %v5159_v57 = vld [vmem:[#allocation15_spill] sm:$0xff] }
  0x43   :  { %5152 = vst [vmem:[#allocation27_spill] sm:$0xff] %v4600_v37  ;;  %3447 = vmatpush3.bf16.msra.mxu1 %v3956_v22  ;;  %3427 = vmatpush3.bf16.msra.mxu0 %v4612_v54  ;;  %v4651_v53 = vpack.c.bf16 %v4453_v43, %v4440_v14  ;;  %v4656_v33 = vpack.c.bf16 %v4479_v20, %v4466_v42  ;;  %v5162_v1 = vand.u32 4294901760, %v4448_v55  ;;  %v5163_v21 = vand.u32 4294901760, %v4339_v3 }
  0x44   :  { %644 = vmatprep.mubr.f32.mxu1 %v5155_v35  ;;  %3449 = vmatprep.subr.bf16.mxu1 %v3958_v23  ;;  %v4663_v50 = vpack.c.bf16 %v4497_v45, %v4494_v9  ;;  %v927_v60 = vmul.f32 %v5161_v17, %v5161_v17  ;;  %v5164_v35 = vand.u32 4294901760, %v4344_v63  ;;  %v5166_v17 = vand.u32 4294901760, %v4373_v19 }
  0x45   :  { %3429 = vmatprep.subr.bf16.mxu0 %v4618_v34  ;;  %v5167_v3 = vand.u32 4294901760, %v4396_v8  ;;  %v5168_v63 = vand.u32 4294901760, %v4410_v31  ;;  %v5169_v19 = vand.u32 4294901760, %v4440_v14  ;;  %v5171_v31 = vand.u32 4294901760, %v4466_v42 }
  0x46   :  { %v4692_v25 = vand.u32 4294901760, %v927_v60  ;;  %v5172_v8 = vand.u32 4294901760, %v4479_v20  ;;  %v5174_v14 = vand.u32 4294901760, %v4497_v45  ;;  %v5176_v45 = vld [vmem:[#allocation21_spill] sm:$0xff] }
  0x47   :  { %3451 = vmatpush3.bf16.msra.mxu1 %v3974_v28  ;;  %3431 = vmatpush3.bf16.msra.mxu0 %v4627_v11 }
  0x48   :  { %3453 = vmatprep.subr.bf16.mxu1 %v3985_v32  ;;  %3433 = vmatprep.subr.bf16.mxu0 %v4632_v36 }
  0x4b   :  { %3455 = vmatpush3.bf16.msra.mxu1 %v4003_v38  ;;  %3435 = vmatpush3.bf16.msra.mxu0 %v4639_v40 }
  0x4c   :  { %3457 = vmatprep.subr.bf16.mxu1 %v4026_v47  ;;  %3437 = vmatprep.subr.bf16.mxu0 %v4644_v10 }
  0x4f   :  { %3459 = vmatpush3.bf16.msra.mxu1 %v4068_v2  ;;  %3439 = vmatpush3.bf16.msra.mxu0 %v4651_v53 }
  0x50   :  { %3461 = vmatprep.subr.bf16.mxu1 %v4124_v18  ;;  %3441 = vmatprep.subr.bf16.mxu0 %v4656_v33 }
  0x53   :  { %3463 = vmatpush3.bf16.msra.mxu1 %v4133_v59  ;;  %3443 = vmatpush3.bf16.msra.mxu0 %v4663_v50 }
  0x54   :  { %3465 = vmatprep.subr.bf16.mxu1 %v4178_v52  ;;  %3477 = vmatprep.subr.bf16.mxu0 %v4550_v58 }
  0x56   :  { %540 = vmatmul.mubr.f32.vlgmr.msra.gmra.mrb[2].mxu0 %v4448_v55  ;;  %v4699_v55 = vpack.c.bf16 %v5164_v35, %v5163_v21  ;;  %v4718_v21 = vpack.c.bf16 %v5168_v63, %v5167_v3  ;;  %v926_v3 = vmul.f32 %v5176_v45, %v5176_v45  ;;  %v5177_v63 = vld [vmem:[#allocation6_spill] sm:$0xff] }
  0x57   :  { %3467 = vmatpush3.bf16.msra.mxu1 %v4230_v24  ;;  %3479 = vmatpush3.bf16.msra.mxu0 %v4556_v12 }
  0x58   :  { %3469 = vmatprep.subr.bf16.mxu1 %v5156_v39  ;;  %814 = vmatprep.mubr.f32.mxu0 %v5157_v44 }
  0x59   :  { %3481 = vmatprep.subr.bf16.mxu0 %v4563_v16 }
  0x5b   :  { %3471 = vmatpush3.bf16.msra.mxu1 %v5158_v48  ;;  %3483 = vmatpush3.bf16.msra.mxu0 %v4569_v7 }
  0x5c   :  { %3473 = vmatprep.subr.bf16.mxu1 %v5159_v57  ;;  %3485 = vmatprep.subr.bf16.mxu0 %v4575_v46 }
  0x5f   :  { %3475 = vmatpush3.bf16.msra.mxu1 %v5160_v13  ;;  %3487 = vmatpush3.bf16.msra.mxu0 %v4581_v4 }
  0x60   :  { %3509 = vmatprep.subr.bf16.mxu1 %v3938_v15  ;;  %3489 = vmatprep.subr.bf16.mxu0 %v4588_v62 }
  0x62   :  { %648 = vmatmul.mubr.f32.vlgmr.msra.gmra.mrb[2].mxu1 %v5162_v1 }
  0x63   :  { %3511 = vmatpush3.bf16.msra.mxu1 %v3956_v22  ;;  %918 = vmatprep.mubr.f32.mxu1 %v5157_v44  ;;  %v5165_v44 = vand.u32 4294901760, %v4361_v26  ;;  %v5170_v26 = vand.u32 4294901760, %v4453_v43  ;;  %v5173_v43 = vand.u32 4294901760, %v4494_v9  ;;  %v5175_v9 = vld [vmem:[#allocation5_spill] sm:$0xff] }
  0x64   :  { %3513 = vmatprep.subr.bf16.mxu1 %v3958_v23  ;;  %3491 = vmatpush3.bf16.msra.mxu0 %v4594_v27 }
  0x65   :  { %3493 = vmatprep.subr.bf16.mxu0 %v4600_v37  ;;  %v4708_v1 = vpack.c.bf16 %v5166_v17, %v5165_v44  ;;  %v4711_v37 = vsub.f32 %v927_v60, %v4692_v25  ;;  %v4727_v60 = vpack.c.bf16 %v5170_v26, %v5169_v19  ;;  %v4735_v44 = vpack.c.bf16 %v5172_v8, %v5171_v31  ;;  %v5178_v19 = vld [vmem:[#allocation7_spill] sm:$0xff]  ;;  %v5179_v31 = vld [vmem:[#allocation8_spill] sm:$0xff]  ;;  %v5180_v8 = vld [vmem:[#allocation9_spill] sm:$0xff] }
  0x66   :  { %v4744_v17 = vpack.c.bf16 %v5174_v14, %v5173_v43  ;;  %v4773_v26 = vand.u32 4294901760, %v926_v3  ;;  %v5181_v43 = vld [vmem:[#allocation10_spill] sm:$0xff]  ;;  %v5182_v14 = vld [vmem:[#allocation12_spill] sm:$0xff] }
  0x67   :  { %3515 = vmatpush3.bf16.msra.mxu1 %v3974_v28  ;;  %v1026_v35 = vand.u32 4294901760, %v4711_v37 }
  0x68   :  { %3517 = vmatprep.subr.bf16.mxu1 %v3985_v32  ;;  %3495 = vmatpush3.bf16.msra.mxu0 %v4606_v29 }
  0x69   :  { %3497 = vmatprep.subr.bf16.mxu0 %v4699_v55  ;;  %v1027_v42 = vsub.f32 %v4711_v37, %v1026_v35 }
  0x6b   :  { %3519 = vmatpush3.bf16.msra.mxu1 %v4003_v38  ;;  %v1028_v20 = vand.u32 4294901760, %v1027_v42 }
  0x6c   :  { %3521 = vmatprep.subr.bf16.mxu1 %v4026_v47  ;;  %3499 = vmatpush3.bf16.msra.mxu0 %v4708_v1 }
  0x6d   :  { %3501 = vmatprep.subr.bf16.mxu0 %v4718_v21 }
  0x6f   :  { %3523 = vmatpush3.bf16.msra.mxu1 %v4068_v2 }
  0x70   :  { %3525 = vmatprep.subr.bf16.mxu1 %v4124_v18  ;;  %3503 = vmatpush3.bf16.msra.mxu0 %v4727_v60 }
  0x71   :  { %3505 = vmatprep.subr.bf16.mxu0 %v4735_v44 }
  0x73   :  { %3527 = vmatpush3.bf16.msra.mxu1 %v4133_v59 }
  0x74   :  { %3529 = vmatprep.subr.bf16.mxu1 %v4178_v52  ;;  %3507 = vmatpush3.bf16.msra.mxu0 %v4744_v17 }
  0x75   :  { %3541 = vmatprep.subr.bf16.mxu0 %v3938_v15 }
  0x77   :  { %3531 = vmatpush3.bf16.msra.mxu1 %v4230_v24  ;;  %816 = vmatmul.mubr.f32.vlgmr.msra.gmra.mrb[4].mxu0 %v4430_v41 }
  0x78   :  { %3533 = vmatprep.subr.bf16.mxu1 %v5156_v39  ;;  %3543 = vmatpush3.bf16.msra.mxu0 %v3956_v22 }
  0x79   :  { %1029 = vmatprep.mubr.f32.mxu0 %v1028_v20  ;;  %3545 = vmatprep.subr.bf16.mxu0 %v3958_v23  ;;  %v5183_v20 = vld [vmem:[#allocation14_spill] sm:$0xff] }
  0x7b   :  { %3535 = vmatpush3.bf16.msra.mxu1 %v5158_v48 }
  0x7c   :  { %3537 = vmatprep.subr.bf16.mxu1 %v5159_v57  ;;  %3547 = vmatpush3.bf16.msra.mxu0 %v3974_v28 }
  0x7d   :  { %3549 = vmatprep.subr.bf16.mxu0 %v3985_v32 }
  0x7f   :  { %3539 = vmatpush3.bf16.msra.mxu1 %v5160_v13 }
  0x80   :  { %3573 = vmatprep.subr.bf16.mxu1 %v5175_v9  ;;  %3551 = vmatpush3.bf16.msra.mxu0 %v4003_v38  ;;  %v5184_v9 = vld [vmem:[#allocation17_spill] sm:$0xff] }
  0x81   :  { %3553 = vmatprep.subr.bf16.mxu0 %v4026_v47 }
  0x82   :  { %920 = vmatmul.mubr.f32.vlgmr.msra.gmra.mrb[4].mxu1 %v4430_v41  ;;  %v4780_v41 = vsub.f32 %v926_v3, %v4773_v26 }
  0x83   :  { %3575 = vmatpush3.bf16.msra.mxu1 %v5177_v63  ;;  %1265 = vmatprep.mubr.f32.mxu1 %v4692_v25  ;;  %v5185_v63 = vld [vmem:[#allocation19_spill] sm:$0xff] }
  0x84   :  { %3577 = vmatprep.subr.bf16.mxu1 %v5178_v19  ;;  %3555 = vmatpush3.bf16.msra.mxu0 %v4068_v2  ;;  %v1032_v42 = vand.u32 4294901760, %v4780_v41  ;;  %v5186_v19 = vld [vmem:[#allocation23_spill] sm:$0xff] }
  0x85   :  { %3557 = vmatprep.subr.bf16.mxu0 %v4124_v18 }
  0x86   :  { %v1033_v3 = vsub.f32 %v4780_v41, %v1032_v42 }
  0x87   :  { %3579 = vmatpush3.bf16.msra.mxu1 %v5179_v31 }
  0x88   :  { %3581 = vmatprep.subr.bf16.mxu1 %v5180_v8  ;;  %3559 = vmatpush3.bf16.msra.mxu0 %v4133_v59  ;;  %v1034_v31 = vand.u32 4294901760, %v1033_v3  ;;  %v5187_v8 = vld [vmem:[#allocation22_spill] sm:$0xff] }
  0x89   :  { %3561 = vmatprep.subr.bf16.mxu0 %v4178_v52 }
  0x8b   :  { %3583 = vmatpush3.bf16.msra.mxu1 %v5181_v43  ;;  %v5188_v43 = vld [vmem:[#allocation24_spill] sm:$0xff] }
  0x8c   :  { %3585 = vmatprep.subr.bf16.mxu1 %v5182_v14  ;;  %3563 = vmatpush3.bf16.msra.mxu0 %v4230_v24  ;;  %v5189_v14 = vld [vmem:[#allocation25_spill] sm:$0xff] }
  0x8d   :  { %3565 = vmatprep.subr.bf16.mxu0 %v5156_v39 }
  0x8f   :  { %3587 = vmatpush3.bf16.msra.mxu1 %v5183_v20  ;;  %v5190_v20 = vld [vmem:[#allocation26_spill] sm:$0xff] }
  0x90   :  { %3589 = vmatprep.subr.bf16.mxu1 %v5184_v9  ;;  %3567 = vmatpush3.bf16.msra.mxu0 %v5158_v48 }
  0x91   :  { %3569 = vmatprep.subr.bf16.mxu0 %v5159_v57 }
  0x93   :  { %3591 = vmatpush3.bf16.msra.mxu1 %v5185_v63 }
  0x94   :  { %3593 = vmatprep.subr.bf16.mxu1 %v5186_v19  ;;  %3571 = vmatpush3.bf16.msra.mxu0 %v5160_v13 }
  0x95   :  { %3605 = vmatprep.subr.bf16.mxu0 %v5187_v8 }
  0x97   :  { %3595 = vmatpush3.bf16.msra.mxu1 %v5188_v43  ;;  %1035 = vmatmul.mubr.f32.vlgmr.msra.gmra.mrb[6].mxu0 %v1034_v31 }
  0x98   :  { %3597 = vmatprep.subr.bf16.mxu1 %v4481_v30  ;;  %3607 = vmatpush3.bf16.msra.mxu0 %v4474_v0 }
  0x99   :  { %1402 = vmatprep.mubr.f32.mxu0 %v4711_v37  ;;  %3609 = vmatprep.subr.bf16.mxu0 %v4505_v61 }
  0x9b   :  { %3599 = vmatpush3.bf16.msra.mxu1 %v5189_v14 }
  0x9c   :  { %3601 = vmatprep.subr.bf16.mxu1 %v5190_v20  ;;  %3611 = vmatpush3.bf16.msra.mxu0 %v4523_v51  ;;  %v5191_v51 = vld [vmem:[#allocation27_spill] sm:$0xff] }
  0x9d   :  { %3613 = vmatprep.subr.bf16.mxu0 %v4530_v6 }
  0x9f   :  { %3603 = vmatpush3.bf16.msra.mxu1 %v4543_v56  ;;  %v56_v56 = vld [vmem:[%s5025_s4 + $0x8] sm:$0xff] }
  0xa0   :  { %3637 = vmatprep.subr.bf16.mxu1 %v3938_v15  ;;  %3615 = vmatpush3.bf16.msra.mxu0 %v4536_v5  ;;  %v1817_v6 = vand.u32 4294901760, %v56_v56 }
  0xa1   :  { %3617 = vmatprep.subr.bf16.mxu0 %v4540_v49  ;;  %v58_v49 = vld [vmem:[%s5025_s4 + $0x18] sm:$0xff] }
  0xa2   :  { %1267 = vmatmul.mubr.f32.vlgmr.msra.gmra.mrb[6].mxu1 %v4773_v26  ;;  %v1821_v5 = vand.u32 4294901760, %v58_v49 }
  0xa3   :  { %3639 = vmatpush3.bf16.msra.mxu1 %v3956_v22  ;;  %1509 = vmatprep.mubr.f32.mxu1 %v1026_v35 }
  0xa4   :  { %3641 = vmatprep.subr.bf16.mxu1 %v3958_v23  ;;  %3619 = vmatpush3.bf16.msra.mxu0 %v4612_v54  ;;  %v61_v54 = vld [vmem:[%s5025_s4 + $0x30] sm:$0xff] }
  0xa5   :  { %3621 = vmatprep.subr.bf16.mxu0 %v4618_v34  ;;  %v4901_v34 = vpack.c.bf16 %v1821_v5, %v1817_v6 }
  0xa7   :  { %3643 = vmatpush3.bf16.msra.mxu1 %v3974_v28 }
  0xa8   :  { %3645 = vmatprep.subr.bf16.mxu1 %v3985_v32  ;;  %3623 = vmatpush3.bf16.msra.mxu0 %v4627_v11 }
  0xa9   :  { %3625 = vmatprep.subr.bf16.mxu0 %v4632_v36  ;;  %v1831_v36 = vand.u32 4294901760, %v61_v54 }
  0xab   :  { %3647 = vmatpush3.bf16.msra.mxu1 %v4003_v38  ;;  %v1944_v31 = vsub.f32 %v61_v54, %v1831_v36 }
  0xac   :  { %3649 = vmatprep.subr.bf16.mxu1 %v4026_v47  ;;  %3627 = vmatpush3.bf16.msra.mxu0 %v4639_v40 }
  0xad   :  { %3629 = vmatprep.subr.bf16.mxu0 %v4644_v10 }
  0xaf   :  { %3651 = vmatpush3.bf16.msra.mxu1 %v4068_v2 }
  0xb0   :  { %3653 = vmatprep.subr.bf16.mxu1 %v4124_v18  ;;  %3631 = vmatpush3.bf16.msra.mxu0 %v4651_v53 }
  0xb1   :  { %3633 = vmatprep.subr.bf16.mxu0 %v4656_v33 }
  0xb3   :  { %3655 = vmatpush3.bf16.msra.mxu1 %v4133_v59 }
  0xb4   :  { %3657 = vmatprep.subr.bf16.mxu1 %v4178_v52  ;;  %3635 = vmatpush3.bf16.msra.mxu0 %v4663_v50 }
  0xb5   :  { %3669 = vmatprep.subr.bf16.mxu0 %v4550_v58  ;;  %v57_v58 = vld [vmem:[%s5025_s4 + $0x10] sm:$0xff] }
  0xb7   :  { %3659 = vmatpush3.bf16.msra.mxu1 %v4230_v24  ;;  %1405 = vmatmul.mubr.f32.vlgmr.msra.gmra.mrb[8].mxu0 %v4780_v41 }
  0xb8   :  { %3661 = vmatprep.subr.bf16.mxu1 %v5156_v39  ;;  %3671 = vmatpush3.bf16.msra.mxu0 %v4556_v12  ;;  %v55_v12 = vld [vmem:[%s5025_s4] sm:$0xff] }
  0xb9   :  { %1679 = vmatprep.mubr.f32.mxu0 %v4692_v25  ;;  %3673 = vmatprep.subr.bf16.mxu0 %v4563_v16  ;;  %v1819_v16 = vand.u32 4294901760, %v55_v12 }
  0xbb   :  { %3663 = vmatpush3.bf16.msra.mxu1 %v5158_v48 }
  0xbc   :  { %3665 = vmatprep.subr.bf16.mxu1 %v5159_v57  ;;  %3675 = vmatpush3.bf16.msra.mxu0 %v4569_v7  ;;  %v60_v7 = vld [vmem:[%s5025_s4 + $0x28] sm:$0xff] }
  0xbd   :  { %3677 = vmatprep.subr.bf16.mxu0 %v4575_v46  ;;  %v62_v46 = vld [vmem:[%s5025_s4 + $0x38] sm:$0xff] }
  0xbe   :  { %v1829_v37 = vand.u32 4294901760, %v62_v46 }
  0xbf   :  { %3667 = vmatpush3.bf16.msra.mxu1 %v5160_v13 }
  0xc0   :  { %3701 = vmatprep.subr.bf16.mxu1 %v3938_v15  ;;  %3679 = vmatpush3.bf16.msra.mxu0 %v4581_v4  ;;  %v3877_v4 = vmov 0.0  }
  0xc1   :  { %3681 = vmatprep.subr.bf16.mxu0 %v4588_v62  ;;  %v1823_v62 = vand.u32 4294901760, %v57_v58 }
  0xc2   :  { %1513 = vmatmul.mubr.f32.vlgmr.msra.gmra.mrb[8].mxu1 %v1032_v42  ;;  %v1938_v42 = vsub.f32 %v62_v46, %v1829_v37 }
  0xc3   :  { %3703 = vmatpush3.bf16.msra.mxu1 %v3956_v22  ;;  %1783 = vmatprep.mubr.f32.mxu1 %v4692_v25  ;;  %v4903_v40 = vpack.c.bf16 %v1823_v62, %v1819_v16  ;;  %v1908_v25 = vsub.f32 %v55_v12, %v1819_v16 }
  0xc4   :  { %3705 = vmatprep.subr.bf16.mxu1 %v3958_v23  ;;  %3683 = vmatpush3.bf16.msra.mxu0 %v4594_v27  ;;  %v1825_v27 = vand.u32 4294901760, %v60_v7 }
  0xc5   :  { %3685 = vmatprep.subr.bf16.mxu0 %v5191_v51 }
  0xc6   :  { %v4905_v10 = vpack.c.bf16 %v1829_v37, %v1825_v27  ;;  %v1926_v41 = vsub.f32 %v60_v7, %v1825_v27 }
  0xc7   :  { %3707 = vmatpush3.bf16.msra.mxu1 %v3974_v28 }
  0xc8   :  { %3709 = vmatprep.subr.bf16.mxu1 %v3985_v32  ;;  %3687 = vmatpush3.bf16.msra.mxu0 %v4606_v29  ;;  %v59_v29 = vld [vmem:[%s5025_s4 + $0x20] sm:$0xff]  ;;  %v1927_v20 = vand.u32 4294901760, %v1926_v41 }
  0xc9   :  { %3689 = vmatprep.subr.bf16.mxu0 %v4699_v55  ;;  %v1827_v11 = vand.u32 4294901760, %v59_v29  ;;  %v1920_v55 = vsub.f32 %v57_v58, %v1823_v62 }
  0xcb   :  { %3711 = vmatpush3.bf16.msra.mxu1 %v4003_v38  ;;  %v4911_v53 = vpack.c.bf16 %v1831_v36, %v1827_v11  ;;  %v1921_v35 = vand.u32 4294901760, %v1920_v55  ;;  %v1932_v19 = vsub.f32 %v59_v29, %v1827_v11 }
  0xcc   :  { %3713 = vmatprep.subr.bf16.mxu1 %v4026_v47  ;;  %3691 = vmatpush3.bf16.msra.mxu0 %v4708_v1 }
  0xcd   :  { %3693 = vmatprep.subr.bf16.mxu0 %v4718_v21  ;;  %v1922_v63 = vsub.f32 %v1920_v55, %v1921_v35  ;;  %v4929_v58 = vpack.c.bf16 %v1944_v31, %v1932_v19 }
  0xcf   :  { %3715 = vmatpush3.bf16.msra.mxu1 %v4068_v2 }
  0xd0   :  { %3717 = vmatprep.subr.bf16.mxu1 %v4124_v18  ;;  %3695 = vmatpush3.bf16.msra.mxu0 %v4727_v60  ;;  %v1909_v60 = vand.u32 4294901760, %v1908_v25 }
  0xd1   :  { %3697 = vmatprep.subr.bf16.mxu0 %v4735_v44 }
  0xd2   :  { %v1910_v3 = vsub.f32 %v1908_v25, %v1909_v60  ;;  %v4933_v27 = vpack.c.bf16 %v1921_v35, %v1909_v60 }
  0xd3   :  { %3719 = vmatpush3.bf16.msra.mxu1 %v4133_v59 }
  0xd4   :  { %3721 = vmatprep.subr.bf16.mxu1 %v4178_v52  ;;  %3699 = vmatpush3.bf16.msra.mxu0 %v4744_v17  ;;  %v1911_v51 = vand.u32 4294901760, %v1910_v3 }
  0xd5   :  { %3733 = vmatprep.subr.bf16.mxu0 %v4901_v34 }
  0xd7   :  { %3723 = vmatpush3.bf16.msra.mxu1 %v4230_v24  ;;  %1681 = vmatmul.mubr.f32.vlgmr.msra.gmra.mrb[10].mxu0 %v4773_v26 }
  0xd8   :  { %3725 = vmatprep.subr.bf16.mxu1 %v5156_v39  ;;  %1889 = vmatprep.mubr.f32.mxu0 %v3877_v4 }
  0xd9   :  { %3735 = vmatpush1.bf16.msra.mxu0 %v4903_v40 }
  0xda   :  { %3737 = vmatprep.subr.bf16.mxu0 %v4905_v10 }
  0xdb   :  { %3727 = vmatpush3.bf16.msra.mxu1 %v5158_v48 }
  0xdc   :  { %3729 = vmatprep.subr.bf16.mxu1 %v5159_v57  ;;  %v1902_v57 = vsub.f32 %v56_v56, %v1817_v6  ;;  %v4925_v6 = vpack.c.bf16 %v1920_v55, %v1908_v25 }
  0xdd   :  { %3739 = vmatpush1.bf16.msra.mxu0 %v4911_v53 }
  0xde   :  { %v1903_v1 = vand.u32 4294901760, %v1902_v57 }
  0xdf   :  { %3731 = vmatpush3.bf16.msra.mxu1 %v5160_v13  ;;  %v1914_v13 = vsub.f32 %v58_v49, %v1821_v5  ;;  %v4927_v5 = vpack.c.bf16 %v1938_v42, %v1926_v41 }
  0xe0   :  { %3781 = vmatprep.subr.bf16.mxu1 %v4901_v34  ;;  %v1904_v17 = vsub.f32 %v1902_v57, %v1903_v1 }
  0xe1   :  { %v1915_v21 = vand.u32 4294901760, %v1914_v13  ;;  %v4923_v12 = vpack.c.bf16 %v1914_v13, %v1902_v57 }
  0xe2   :  { %1785 = vmatmul.mubr.f32.vlgmr.msra.gmra.mrb[10].mxu1 %v4773_v26  ;;  %v1905_v43 = vand.u32 4294901760, %v1904_v17 }
  0xe3   :  { %2435 = vmatprep.mubr.f32.mxu1 %v3877_v4  ;;  %3783 = vmatpush1.bf16.msra.mxu1 %v4903_v40  ;;  %v1916_v26 = vsub.f32 %v1914_v13, %v1915_v21  ;;  %v4931_v62 = vpack.c.bf16 %v1915_v21, %v1903_v1 }
  0xe4   :  { %3785 = vmatprep.subr.bf16.mxu1 %v4905_v10 }
  0xe5   :  { %v1917_v14 = vand.u32 4294901760, %v1916_v26 }
  0xe7   :  { %3787 = vmatpush1.bf16.msra.mxu1 %v4911_v53 }
 0x109   :  { %v2960_v15 = vpop.f32.mrb[0].mxu0 }
 0x10a   :  { %v2961_v22 = vpop.f32.mrb[1].mxu0 }
 0x10b   :  { %v2962_v23 = vadd.f32 %v2961_v22, %v2960_v15  ;;  %v1923_v15 = vand.u32 4294901760, %v1922_v63  ;;  %v1939_v22 = vand.u32 4294901760, %v1938_v42 }
 0x10d   :  { %v4935_v29 = vpack.c.bf16 %v1939_v22, %v1927_v20 }
 0x115   :  { %v2995_v28 = vpop.f32.mrb[0].mxu1 }
 0x116   :  { %v2996_v32 = vpop.f32.mrb[1].mxu1 }
 0x117   :  { %v2997_v38 = vadd.f32 %v2996_v32, %v2995_v28  ;;  %v3740_v32 = vpack.c.bf16 %v1917_v14, %v1905_v43  ;;  %v2926_v43 = vld [vmem:[%s5022_s1] ss:$0 sm:$0xff]  ;;  %s3878_s1 = smov [#allocation2]  }
 0x119   :  { %v404_v47 = vadd.f32 %v2997_v38, %v2962_v23  ;;  %v1933_v23 = vand.u32 4294901760, %v1932_v19  ;;  %v1928_v38 = vsub.f32 %v1926_v41, %v1927_v20  ;;  %3741 = vmatprep.subr.bf16.mxu0 %v3740_v32  ;;  %3789 = vmatprep.subr.bf16.mxu1 %v3740_v32 }
 0x129   :  { %v3030_v2 = vpop.f32.mrb[2].mxu0 }
 0x12a   :  { %v3031_v18 = vpop.f32.mrb[3].mxu0 }
 0x12b   :  { %v3032_v59 = vadd.f32 %v3031_v18, %v3030_v2  ;;  %v4917_v2 = vpack.c.bf16 %v1923_v15, %v1911_v51  ;;  %v1940_v18 = vsub.f32 %v1938_v42, %v1939_v22  ;;  %v2927_v51 = vld [vmem:[%s5023_s2] ss:$0 sm:$0xff]  ;;  %s2918_s2 = sshll.u32 %s3878_s1, 4  ;;  %s2919_s2 = int_to_ptr.vmem [resolvable:$true] %s2918_s2 }
 0x12c   :  { %s3853_s6 = scalar_lea.vmem %s2919_s2, 256  ;;  %p3858_p1 = scmp.lt.s32.totalorder %s2919_s2, %s2919_s2 }
 0x12d   :  { %v542_v52 = vadd.f32 %v3032_v59, %v404_v47  ;;  %v1945_v47 = vand.u32 4294901760, %v1944_v31  ;;  %v1934_v59 = vsub.f32 %v1932_v19, %v1933_v23  ;;  %p3854_p0 = scmp.ne.s32.totalorder %s2919_s2, %s3853_s6  ;;  %p3859_p2 = scmp.lt.s32.totalorder %s3853_s6, %s3853_s6 }
 0x12f   :  { %v4937_v11 = vpack.c.bf16 %v1945_v47, %v1933_v23  ;;  %p3860_p3 = por %p3859_p2, %p3858_p1 }
 0x131   :  { %p3861_p4 = pnand %p3860_p3, %p3854_p0 }
 0x135   :  { %v3065_v24 = vpop.f32.mrb[2].mxu1 }
 0x136   :  { %v3066_v0 = vpop.f32.mrb[3].mxu1 }
 0x137   :  { %v3067_v30 = vadd.f32 %v3066_v0, %v3065_v24  ;;  %v1946_v24 = vsub.f32 %v1944_v31, %v1945_v47  ;;  %v1941_v0 = vand.u32 4294901760, %v1940_v18 }
 0x139   :  { %v650_v61 = vadd.f32 %v3067_v30, %v542_v52  ;;  %v1929_v52 = vand.u32 4294901760, %v1928_v38  ;;  %v1935_v30 = vand.u32 4294901760, %v1934_v59 }
 0x13b   :  { %v4919_v56 = vpack.c.bf16 %v1941_v0, %v1929_v52 }
 0x14a   :  { %v3100_v33 = vpop.f32.mrb[4].mxu0 }
 0x14b   :  { %v3101_v50 = vpop.f32.mrb[5].mxu0 }
 0x14c   :  { %v3102_v39 = vadd.f32 %v3101_v50, %v3100_v33 }
 0x14e   :  { %v818_v48 = vadd.f32 %v3102_v39, %v650_v61  ;;  %v1947_v61 = vand.u32 4294901760, %v1946_v24 }
 0x150   :  { %v4921_v49 = vpack.c.bf16 %v1947_v61, %v1935_v30 }
 0x155   :  { %v3135_v44 = vpop.f32.mrb[4].mxu1 }
 0x156   :  { %v3136_v9 = vpop.f32.mrb[5].mxu1 }
 0x157   :  { %v3137_v8 = vadd.f32 %v3136_v9, %v3135_v44 }
 0x159   :  { %v922_v28 = vadd.f32 %v3137_v8, %v818_v48 }
 0x15b   :  { %v925_v41 = vmul.f32 0.125, %v922_v28 }
 0x15d   :  { %v1791_v3 = vmul.f32 %v925_v41, %v925_v41 }
 0x16a   :  { %v3170_v16 = vpop.f32.mrb[6].mxu0 }
 0x16b   :  { %v3171_v7 = vpop.f32.mrb[7].mxu0 }
 0x16c   :  { %v3172_v46 = vadd.f32 %v3171_v7, %v3170_v16 }
 0x175   :  { %v3205_v37 = vpop.f32.mrb[6].mxu1 }
 0x176   :  { %v3206_v54 = vpop.f32.mrb[7].mxu1 }
 0x177   :  { %v3207_v36 = vadd.f32 %v3206_v54, %v3205_v37 }
 0x179   :  { %v1269_v33 = vadd.f32 %v3207_v36, %v3172_v46 }
 0x18a   :  { %v3240_v50 = vpop.f32.mrb[8].mxu0 }
 0x18b   :  { %v3241_v39 = vpop.f32.mrb[9].mxu0 }
 0x18c   :  { %v3242_v48 = vadd.f32 %v3241_v39, %v3240_v50 }
 0x18e   :  { %v1407_v57 = vadd.f32 %v3242_v48, %v1269_v33 }
 0x195   :  { %v3275_v13 = vpop.f32.mrb[8].mxu1 }
 0x196   :  { %v3276_v25 = vpop.f32.mrb[9].mxu1 }
 0x197   :  { %v3277_v55 = vadd.f32 %v3276_v25, %v3275_v13 }
 0x199   :  { %v1515_v44 = vadd.f32 %v3277_v55, %v1407_v57 }
 0x1aa   :  { %v3310_v1 = vpop.f32.mrb[10].mxu0 }
 0x1ab   :  { %v3311_v21 = vpop.f32.mrb[11].mxu0 }
 0x1ac   :  { %v3312_v60 = vadd.f32 %v3311_v21, %v3310_v1 }
 0x1ae   :  { %v1683_v35 = vadd.f32 %v3312_v60, %v1515_v44 }
 0x1b5   :  { %v3345_v17 = vpop.f32.mrb[10].mxu1 }
 0x1b6   :  { %v3346_v26 = vpop.f32.mrb[11].mxu1 }
 0x1b7   :  { %v3347_v42 = vadd.f32 %v3346_v26, %v3345_v17 }
 0x1b9   :  { %v1787_v9 = vadd.f32 %v3347_v42, %v1683_v35 }
 0x1bb   :  { %v1790_v63 = vmul.f32 0.125, %v1787_v9 }
 0x1bd   :  { %v1792_v19 = vsub.f32 %v1790_v63, %v1791_v3 }
 0x1bf   :  { %v1793_v31 = vmax.f32 %v1792_v19, 0.0 }
 0x1c1   :  { %v1796_v8 = vadd.f32 1e-05, %v1793_v31 }
 0x1c3   :  { %3850 = vrsqrt.f32 %v1796_v8 }
 0x1cd   :  { %v3851_v14 = vpop.eup %3850 }
 0x1ce   :  { %v1804_v20 = vmul.f32 %v3851_v14, %v2926_v43 }
 0x1d0   :  { %v1815_v15 = vsel %vm1813_vm0, %v1804_v20, 0  ;;  %v1805_v22 = vmul.f32 %v1804_v20, %v925_v41 }
 0x1d1   :  { %v4945_v23 = vand.u32 4294901760, %v1815_v15 }
 0x1d2   :  { %v1812_v28 = vsub.f32 %v2927_v51, %v1805_v22 }
 0x1d3   :  { %v1891_v32 = vsub.f32 %v1815_v15, %v4945_v23 }
 0x1d4   :  { %v2361_v38 = vsel %vm1813_vm0, %v1812_v28, 0 }
 0x1d5   :  { %v1892_v47 = vand.u32 4294901760, %v1891_v32  ;;  %v4948_v18 = vand.u32 4294901760, %v2361_v38 }
 0x1d7   :  { %v1893_v59 = vsub.f32 %v1891_v32, %v1892_v47  ;;  %v2437_v52 = vsub.f32 %v2361_v38, %v4948_v18 }
 0x1d9   :  { %v1894_v24 = vand.u32 4294901760, %v1893_v59  ;;  %v2438_v0 = vand.u32 4294901760, %v2437_v52 }
 0x1db   :  { %1895 = vmatmul.mubr.f32.vlgmr.msra.gmra.mrb[12].mxu0 %v1894_v24  ;;  %v2439_v30 = vsub.f32 %v2437_v52, %v2438_v0 }
 0x1dc   :  { %3743 = vmatpush1.bf16.msra.mxu0 %v4917_v2  ;;  %2005 = vmatprep.mubr.f32.mxu0 %v3877_v4 }
 0x1dd   :  { %3745 = vmatprep.subr.bf16.mxu0 %v4919_v56  ;;  %v2440_v61 = vand.u32 4294901760, %v2439_v30 }
 0x1df   :  { %2441 = vmatmul.mubr.f32.vlgmr.msra.gmra.mrb[12].mxu1 %v2440_v61 }
 0x1e0   :  { %3791 = vmatpush1.bf16.msra.mxu1 %v4917_v2  ;;  %3747 = vmatpush1.bf16.msra.mxu0 %v4921_v49 }
 0x1e1   :  { %3793 = vmatprep.subr.bf16.mxu1 %v4919_v56  ;;  %3749 = vmatprep.subr.bf16.mxu0 %v4923_v12 }
 0x1e2   :  { %2551 = vmatprep.mubr.f32.mxu1 %v3877_v4 }
 0x1e3   :  { %2007 = vmatmul.mubr.f32.vlgmr.msra.gmra.mrb[12].mxu0 %v4945_v23 }
 0x1e4   :  { %3795 = vmatpush1.bf16.msra.mxu1 %v4921_v49  ;;  %3751 = vmatpush1.bf16.msra.mxu0 %v4925_v6 }
 0x1e5   :  { %3797 = vmatprep.subr.bf16.mxu1 %v4923_v12  ;;  %3753 = vmatprep.subr.bf16.mxu0 %v4927_v5 }
 0x1e6   :  { %2093 = vmatprep.mubr.f32.mxu0 %v3877_v4 }
 0x1e7   :  { %2553 = vmatmul.mubr.f32.vlgmr.msra.gmra.mrb[12].mxu1 %v4948_v18 }
 0x1e8   :  { %3799 = vmatpush1.bf16.msra.mxu1 %v4925_v6  ;;  %3755 = vmatpush1.bf16.msra.mxu0 %v4929_v58 }
 0x1e9   :  { %3801 = vmatprep.subr.bf16.mxu1 %v4927_v5  ;;  %3757 = vmatprep.subr.bf16.mxu0 %v4901_v34 }
 0x1ea   :  { %2639 = vmatprep.mubr.f32.mxu1 %v3877_v4 }
 0x1eb   :  { %2096 = vmatmul.mubr.f32.vlgmr.msra.gmra.mrb[12].mxu0 %v1891_v32 }
 0x1ec   :  { %3803 = vmatpush1.bf16.msra.mxu1 %v4929_v58  ;;  %3759 = vmatpush1.bf16.msra.mxu0 %v4903_v40 }
 0x1ed   :  { %3805 = vmatprep.subr.bf16.mxu1 %v4901_v34  ;;  %3761 = vmatprep.subr.bf16.mxu0 %v4905_v10 }
 0x1ee   :  { %2174 = vmatprep.mubr.f32.mxu0 %v3877_v4 }
 0x1ef   :  { %2642 = vmatmul.mubr.f32.vlgmr.msra.gmra.mrb[12].mxu1 %v2437_v52 }
 0x1f0   :  { %3807 = vmatpush1.bf16.msra.mxu1 %v4903_v40  ;;  %3763 = vmatpush1.bf16.msra.mxu0 %v4911_v53 }
 0x1f1   :  { %3809 = vmatprep.subr.bf16.mxu1 %v4905_v10  ;;  %3765 = vmatprep.subr.bf16.mxu0 %v4931_v62 }
 0x1f2   :  { %2720 = vmatprep.mubr.f32.mxu1 %v3877_v4 }
 0x1f3   :  { %2178 = vmatmul.mubr.f32.vlgmr.msra.gmra.mrb[12].mxu0 %v1892_v47 }
 0x1f4   :  { %3811 = vmatpush1.bf16.msra.mxu1 %v4911_v53  ;;  %3767 = vmatpush1.bf16.msra.mxu0 %v4933_v27 }
 0x1f5   :  { %3813 = vmatprep.subr.bf16.mxu1 %v4931_v62  ;;  %3769 = vmatprep.subr.bf16.mxu0 %v4935_v29 }
 0x1f6   :  { %2272 = vmatprep.mubr.f32.mxu0 %v3877_v4 }
 0x1f7   :  { %2724 = vmatmul.mubr.f32.vlgmr.msra.gmra.mrb[12].mxu1 %v2438_v0 }
 0x1f8   :  { %3815 = vmatpush1.bf16.msra.mxu1 %v4933_v27  ;;  %3771 = vmatpush1.bf16.msra.mxu0 %v4937_v11 }
 0x1f9   :  { %3817 = vmatprep.subr.bf16.mxu1 %v4935_v29  ;;  %3773 = vmatprep.subr.bf16.mxu0 %v4901_v34 }
 0x1fa   :  { %2818 = vmatprep.mubr.f32.mxu1 %v3877_v4 }
 0x1fb   :  { %2274 = vmatmul.mubr.f32.vlgmr.msra.gmra.mrb[12].mxu0 %v4945_v23 }
 0x1fc   :  { %3819 = vmatpush1.bf16.msra.mxu1 %v4937_v11  ;;  %3775 = vmatpush1.bf16.msra.mxu0 %v4903_v40 }
 0x1fd   :  { %3821 = vmatprep.subr.bf16.mxu1 %v4901_v34  ;;  %3777 = vmatprep.subr.bf16.mxu0 %v4905_v10 }
 0x1fe   :  { %2352 = vmatprep.mubr.f32.mxu0 %v3877_v4 }
 0x1ff   :  { %2820 = vmatmul.mubr.f32.vlgmr.msra.gmra.mrb[12].mxu1 %v4948_v18 }
 0x200   :  { %3823 = vmatpush1.bf16.msra.mxu1 %v4903_v40  ;;  %3779 = vmatpush1.bf16.msra.mxu0 %v4911_v53  ;;  %v3852_v40 = vld [vmem:[%s5021_s0 + $0x8] sm:$0xff] }
 0x201   :  { %3825 = vmatprep.subr.bf16.mxu1 %v4905_v10  ;;  %2898 = vmatprep.mubr.f32.mxu1 %v3877_v4 }
 0x203   :  { %2354 = vmatmul.mubr.f32.vlgmr.msra.gmra.mrb[12].mxu0 %v4945_v23 }
 0x204   :  { %3827 = vmatpush1.bf16.msra.mxu1 %v4911_v53 }
 0x207   :  { %2900 = vmatmul.mubr.f32.vlgmr.msra.gmra.mrb[12].mxu1 %v4948_v18 }
 0x2d6   :  { %v2355_v34 = vpop.f32.mrb[12].mxu0 }
 0x2d7   :  { %v2357_v2 = vpop.f32.mrb[13].mxu0  ;;  %v2906_v56 = vmul.f32 %v2355_v34, %v5176_v45 }
 0x2d8   :  { %v2907_v49 = vmul.f32 %v3852_v40, %v2357_v2 }
 0x2da   :  { %v2901_v10 = vpop.f32.mrb[12].mxu1 }
 0x2db   :  { %v2908_v12 = vadd.f32 %v2906_v56, %v2901_v10  ;;  %v2903_v4 = vpop.f32.mrb[13].mxu1 }
 0x2dc   :  { %v2909_v6 = vadd.f32 %v2907_v49, %v2903_v4 }
 0x2dd   :  { %2910 = vst [vmem:[#allocation2] sm:$0xff] %v2908_v12 }
 0x2de   :  { %2911 = vst [vmem:[#allocation2 + $0x8] sm:$0xff] %v2909_v6 }
 0x2df   :  { %3864 = shalt.err (!%p3861_p4)
}
 0x2e0   :  { %s3865_s8 = scalar_lea.hbm %s5026_s5, 256 }
 0x2e1   :  { %p3866_p5 = scmp.ne.s32.totalorder %s5026_s5, %s3865_s8  ;;  %p3869_p6 = scmp.lt.u32.totalorder %s3865_s8, %s5026_s5 }
 0x2e3   :  { %p3871_p7 = pnand %p3869_p6, %p3866_p5 }
 0x2e5   :  { %3874 = shalt.err (!%p3871_p7)
}
 0x2e6   :  { %2921 = dma.vmem_to_hbm [thread:$0]  %s2919_s2, 256, %s5026_s5, [#allocation3]  }
 0x2e7   :  { %3875 = dma.done.wait [#allocation3], 256  }
 0x2e8   :  { %3876 = vsyncadd [#allocation3], 4294967040 }
 0x2e9   :  { %2925 = vsyncpa [#allocation3], 1 }

</bundles_post_ra>
